<compile_context>
chip_gen: v7x
topology: tpu7x:2x2x1
jax: 0.10.0
libtpu: 0.0.40
codegen_flags: <defaults>
</compile_context>

<pallas_src>
import functools

import jax
import jax.numpy as jnp
from jax import lax
from jax.experimental import pallas as pl
from jax.experimental.pallas import tpu as pltpu


# ------------------------------ Pallas kernel ------------------------------ #

def _fused_deconv_kernel(x_ref, w1_ref, w2_ref, b1_ref, b2_ref, mask_ref,
                         o_ref, stage_ref, *, tap_offsets):
    """conv3x3 -> ReLU -> conv3x3 -> ReLU on a flattened zero-padded grid.

    x_ref:     (1, C0, S)      padded input (fb||fv concat, channel-padded), spatial
                               flattened on the lane axis
    w1_ref:    (C1, 9*C0)      conv1 weights, K ordered (tap, in_channel)
    w2_ref:    (C2, 9*C1)      conv2 weights, same K ordering
    b1_ref:    (C1, 1) f32     b2_ref: (C2, 1) f32
    mask_ref:  (1, S)  f32     1.0 at real pixels, 0.0 at padding / alignment tail
    o_ref:     (1, C2, S)
    stage_ref: (9*max(C0,C1), S) VMEM scratch holding the 9 rolled tap planes
    """
    S = x_ref.shape[-1]
    C0 = x_ref.shape[1]
    C1 = b1_ref.shape[0]

    x = x_ref[0]                                   # (C0, S)

    # ---- conv1: stage the 9 tap-shifted planes, then ONE (C1, 9*C0)@(9*C0, S) dot.
    for t, off in enumerate(tap_offsets):
        sh = (-off) % S                            # static python int
        stage_ref[t * C0:(t + 1) * C0, :] = x if sh == 0 else pltpu.roll(x, sh, axis=1)
    acc1 = jnp.dot(w1_ref[...], stage_ref[:9 * C0, :],
                   preferred_element_type=jnp.float32)           # (C1, S) f32

    # Masking the non-interior positions reconstructs exactly the zero padding that
    # conv2's padding=1 expects.  `mid` never leaves VMEM.
    mid = (jnp.maximum(acc1 + b1_ref[...], 0.0) * mask_ref[...]).astype(stage_ref.dtype)

    # ---- conv2: same staging trick, single (C2, 9*C1)@(9*C1, S) dot.
    for t, off in enumerate(tap_offsets):
        sh = (-off) % S
        stage_ref[t * C1:(t + 1) * C1, :] = mid if sh == 0 else pltpu.roll(mid, sh, axis=1)
    acc2 = jnp.dot(w2_ref[...], stage_ref[:9 * C1, :],
                   preferred_element_type=jnp.float32)           # (C2, S) f32

    o_ref[0] = jnp.maximum(acc2 + b2_ref[...], 0.0).astype(o_ref.dtype)


# -------------------------------- Wrapper ----------------------------------- #

def _round_up(x, m):
    return ((x + m - 1) // m) * m


def deconv_forward(params, fea_before, fea_vgg, *, compute_dtype=None):
    """Matches Deconv.forward. Inputs/outputs are NCHW.

    compute_dtype: dtype of activations/weights fed to the MXU (accumulation is
    always f32).  Use jnp.bfloat16 for production bandwidth-bound configs.
    """
    N, Cin, H, W = fea_before.shape
    assert fea_vgg.shape == (N, Cin, H, W)
    w1, b1 = params["w1"], params["b1"]
    w2, b2 = params["w2"], params["b2"]
    C1, C2 = w1.shape[0], w2.shape[0]
    assert w1.shape == (C1, 2 * Cin, 3, 3) and w2.shape == (C2, C1, 3, 3)

    cdt = compute_dtype or fea_before.dtype

    # Channel padding to multiples of 8 -> aligned sublane blocks in the staging
    # buffer and unmasked output stores.
    C0p = _round_up(2 * Cin, 8)
    C1p = _round_up(C1, 8)
    C2p = _round_up(C2, 8)

    # Padded-grid layout: rows 1..H, cols 1..W hold real pixels, everything else 0.
    # Wp multiple of 8 and Hp multiple of 16 => S = Hp*Wp is a multiple of 128.
    Wp = _round_up(W + 2, 8)
    Hp = _round_up(H + 2, 16)
    S = Hp * Wp

    # Merged input: concat(fb, fv) on channels, pad channels + 1-pixel spatial border
    # (+ alignment tail), flatten spatial to the lane axis.  XLA fuses concat+pad
    # into a single materialization.
    x = jnp.concatenate([fea_before, fea_vgg], axis=1)            # (N, 2Cin, H, W)
    x = jnp.pad(x, ((0, 0), (0, C0p - 2 * Cin), (1, Hp - H - 1), (1, Wp - W - 1)))
    x = x.reshape(N, C0p, S).astype(cdt)

    # Fold all 9 taps into a single 2-D weight: K index = tap*Cin_p + in_channel,
    # matching the staging-buffer row layout in the kernel.
    def big_weight(w, co_p, ci_p):
        co, ci = w.shape[0], w.shape[1]
        wpad = jnp.pad(w, ((0, co_p - co), (0, ci_p - ci), (0, 0), (0, 0)))
        return jnp.transpose(wpad, (0, 2, 3, 1)).reshape(co_p, 9 * ci_p).astype(cdt)

    w1_big = big_weight(w1, C1p, C0p)                              # (C1p, 9*C0p)
    w2_big = big_weight(w2, C2p, C1p)                              # (C2p, 9*C1p)
    b1c = jnp.pad(b1, (0, C1p - C1)).reshape(C1p, 1).astype(jnp.float32)
    b2c = jnp.pad(b2, (0, C2p - C2)).reshape(C2p, 1).astype(jnp.float32)

    # Interior mask over the flattened padded grid.
    row = lax.broadcasted_iota(jnp.int32, (Hp, Wp), 0)
    col = lax.broadcasted_iota(jnp.int32, (Hp, Wp), 1)
    mask = ((row >= 1) & (row <= H) & (col >= 1) & (col <= W))
    mask = mask.astype(jnp.float32).reshape(1, S)

    # Flat-index offsets of the 3x3 taps on the padded grid.
    tap_offsets = tuple((dy - 1) * Wp + (dx - 1) for dy in range(3) for dx in range(3))

    kernel = functools.partial(_fused_deconv_kernel, tap_offsets=tap_offsets)

    Kmax = max(C0p, C1p)
    isz = jnp.dtype(cdt).itemsize
    osz = jnp.dtype(fea_before.dtype).itemsize

    flops = 2 * N * S * 9 * (C0p * C1p + C1p * C2p)
    bytes_accessed = (N * S * (C0p * isz + C2p * osz)
                      + 9 * isz * (C0p * C1p + C1p * C2p)
                      + 4 * (S + C1p + C2p))

    # Double-buffered in/out blocks + staging scratch + live f32 temporaries.
    # Capped at 48 MiB (v7x physical VMEM is 64 MiB).  For H*W large enough that
    # this estimate exceeds the cap, a row-tiled grid axis with a 2-row halo is the
    # real fix (not needed at these shapes).
    est_vmem = (2 * C0p * S * isz + 2 * C2p * S * osz
                + 9 * Kmax * S * isz + (2 * C1p + C2p) * S * 4 + 4 * S)
    vmem_limit = int(min(max(int(est_vmem * 1.5), 32 * 1024 * 1024), 48 * 1024 * 1024))

    out_flat = pl.pallas_call(
        kernel,
        out_shape=jax.ShapeDtypeStruct((N, C2p, S), fea_before.dtype),
        grid_spec=pltpu.PrefetchScalarGridSpec(
            num_scalar_prefetch=0,
            grid=(N,),
            in_specs=[
                pl.BlockSpec((1, C0p, S), lambda n: (n, 0, 0)),
                pl.BlockSpec((C1p, 9 * C0p), lambda n: (0, 0)),
                pl.BlockSpec((C2p, 9 * C1p), lambda n: (0, 0)),
                pl.BlockSpec((C1p, 1), lambda n: (0, 0)),
                pl.BlockSpec((C2p, 1), lambda n: (0, 0)),
                pl.BlockSpec((1, S), lambda n: (0, 0)),
            ],
            out_specs=pl.BlockSpec((1, C2p, S), lambda n: (n, 0, 0)),
            scratch_shapes=[pltpu.VMEM((9 * Kmax, S), cdt)],
        ),
        compiler_params=pltpu.CompilerParams(
            dimension_semantics=("parallel",),
            vmem_limit_bytes=vmem_limit,
        ),
        cost_estimate=pl.CostEstimate(
            flops=flops, transcendentals=0, bytes_accessed=bytes_accessed),
    )(x, w1_big, w2_big, b1c, b2c, mask)

    # Channel-major output: free reshape, then crop the channel pad + spatial border.
    out = out_flat.reshape(N, C2p, Hp, Wp)[:, :C2, 1:H + 1, 1:W + 1]
    return out


def init_deconv_params(key, in_channels, out_channels, dtype=jnp.float32):
    k1, k2, k3, k4 = jax.random.split(key, 4)
    w1 = 0.1 * jax.random.normal(k1, (out_channels, in_channels * 2, 3, 3), dtype)
    b1 = 0.1 * jax.random.normal(k2, (out_channels,), dtype)
    w2 = 0.1 * jax.random.normal(k3, (out_channels, out_channels, 3, 3), dtype)
    b2 = 0.1 * jax.random.normal(k4, (out_channels,), dtype)
    return {"w1": w1, "b1": b1, "w2": w2, "b2": b2}


# ----------------------------- JAX reference -------------------------------- #

def _ref_conv(x_nchw, w_oihw, b):
    y = lax.conv_general_dilated(
        x_nchw, w_oihw, window_strides=(1, 1), padding="SAME",
        dimension_numbers=("NCHW", "OIHW", "NCHW"))
    return jnp.maximum(y + b[None, :, None, None], 0.0)


def deconv_ref(params, fea_before, fea_vgg):
    x = jnp.concatenate([fea_before, fea_vgg], axis=1)
    return _ref_conv(_ref_conv(x, params["w1"], params["b1"]),
                     params["w2"], params["b2"])


# ---------------------------------- main ------------------------------------ #

if __name__ == "__main__":
    key = jax.random.PRNGKey(0)
    k_p, k_a, k_b = jax.random.split(key, 3)

    N, C_in, C_out, H, W = 2, 4, 4, 16, 16
    params = init_deconv_params(k_p, C_in, C_out)

    fea_before = jax.random.normal(k_a, (N, C_in, H, W), jnp.float32)
    fea_vgg = jax.random.normal(k_b, (N, C_in, H, W), jnp.float32)

    # f32 compute here so the 1e-3 check is safe; pass compute_dtype=jnp.bfloat16
    # for bandwidth-bound production configs (re-validate tolerance).
    out = jax.jit(deconv_forward)(params, fea_before, fea_vgg)
    out = jax.block_until_ready(out)

    ref = deconv_ref(params, fea_before, fea_vgg)
    assert out.shape == (N, C_out, H, W), out.shape
    err = float(jnp.max(jnp.abs(out - ref)))
    assert err < 1e-3, err

    print("KERNEL_OK")
</pallas_src>

<mosaic_0001>
module attributes {stable_mosaic.version = 11 : i64} {
  func.func @_fused_deconv_kernel(%arg0: i32, %arg1: memref<1x8x768xf32, #tpu.memory_space<vmem>>, %arg2: memref<8x72xf32, #tpu.memory_space<vmem>>, %arg3: memref<8x72xf32, #tpu.memory_space<vmem>>, %arg4: memref<8x1xf32, #tpu.memory_space<vmem>>, %arg5: memref<8x1xf32, #tpu.memory_space<vmem>>, %arg6: memref<1x768xf32, #tpu.memory_space<vmem>>, %arg7: memref<1x8x768xf32, #tpu.memory_space<vmem>>, %arg8: memref<72x768xf32, #tpu.memory_space<vmem>>) attributes {dimension_semantics = [#tpu.dimension_semantics<parallel>], iteration_bounds = array<i64: 2>, scalar_prefetch = 0 : i64, scratch_operands = 1 : i64, tpu.core_type = #tpu.core_type<tc>, window_params = [{transform_indices = @transform_0, window_bounds = array<i64: 1, 8, 768>}, {pipeline_mode = #tpu.pipeline_mode<synchronous>, transform_indices = @transform_1, window_bounds = array<i64: 8, 72>}, {pipeline_mode = #tpu.pipeline_mode<synchronous>, transform_indices = @transform_2, window_bounds = array<i64: 8, 72>}, {pipeline_mode = #tpu.pipeline_mode<synchronous>, transform_indices = @transform_3, window_bounds = array<i64: 8, 1>}, {pipeline_mode = #tpu.pipeline_mode<synchronous>, transform_indices = @transform_4, window_bounds = array<i64: 8, 1>}, {pipeline_mode = #tpu.pipeline_mode<synchronous>, transform_indices = @transform_5, window_bounds = array<i64: 1, 768>}, {transform_indices = @transform_6, window_bounds = array<i64: 1, 8, 768>}]} {
    %c0 = arith.constant 0 : index
    %c0_0 = arith.constant 0 : index
    %c0_1 = arith.constant 0 : index
    %0 = vector.load %arg1[%c0, %c0_0, %c0_1] : memref<1x8x768xf32, #tpu.memory_space<vmem>>, vector<1x8x768xf32>
    %1 = vector.shape_cast %0 : vector<1x8x768xf32> to vector<8x768xf32>
    %c25_i32 = arith.constant 25 : i32
    %2 = tpu.dynamic_rotate %1 by %c25_i32 dim 1 : vector<8x768xf32>, i32 -> vector<8x768xf32>
    %c0_2 = arith.constant 0 : index
    %c0_3 = arith.constant 0 : index
    %3 = vector.load %arg8[%c0_2, %c0_3] : memref<72x768xf32, #tpu.memory_space<vmem>>, vector<8x768xf32>
    tpu.vector_store %arg8[%c0_2, %c0_3], %2 {strides = array<i32>} : memref<72x768xf32, #tpu.memory_space<vmem>>, vector<8x768xf32>,
    %c24_i32 = arith.constant 24 : i32
    %4 = tpu.dynamic_rotate %1 by %c24_i32 dim 1 : vector<8x768xf32>, i32 -> vector<8x768xf32>
    %c8 = arith.constant 8 : index
    %c0_4 = arith.constant 0 : index
    %5 = vector.load %arg8[%c8, %c0_4] : memref<72x768xf32, #tpu.memory_space<vmem>>, vector<8x768xf32>
    tpu.vector_store %arg8[%c8, %c0_4], %4 {strides = array<i32>} : memref<72x768xf32, #tpu.memory_space<vmem>>, vector<8x768xf32>,
    %c23_i32 = arith.constant 23 : i32
    %6 = tpu.dynamic_rotate %1 by %c23_i32 dim 1 : vector<8x768xf32>, i32 -> vector<8x768xf32>
    %c16 = arith.constant 16 : index
    %c0_5 = arith.constant 0 : index
    %7 = vector.load %arg8[%c16, %c0_5] : memref<72x768xf32, #tpu.memory_space<vmem>>, vector<8x768xf32>
    tpu.vector_store %arg8[%c16, %c0_5], %6 {strides = array<i32>} : memref<72x768xf32, #tpu.memory_space<vmem>>, vector<8x768xf32>,
    %c1_i32 = arith.constant 1 : i32
    %8 = tpu.dynamic_rotate %1 by %c1_i32 dim 1 : vector<8x768xf32>, i32 -> vector<8x768xf32>
    %c24 = arith.constant 24 : index
    %c0_6 = arith.constant 0 : index
    %9 = vector.load %arg8[%c24, %c0_6] : memref<72x768xf32, #tpu.memory_space<vmem>>, vector<8x768xf32>
    tpu.vector_store %arg8[%c24, %c0_6], %8 {strides = array<i32>} : memref<72x768xf32, #tpu.memory_space<vmem>>, vector<8x768xf32>,
    %c32 = arith.constant 32 : index
    %c0_7 = arith.constant 0 : index
    %10 = vector.load %arg8[%c32, %c0_7] : memref<72x768xf32, #tpu.memory_space<vmem>>, vector<8x768xf32>
    tpu.vector_store %arg8[%c32, %c0_7], %1 {strides = array<i32>} : memref<72x768xf32, #tpu.memory_space<vmem>>, vector<8x768xf32>,
    %c767_i32 = arith.constant 767 : i32
    %11 = tpu.dynamic_rotate %1 by %c767_i32 dim 1 : vector<8x768xf32>, i32 -> vector<8x768xf32>
    %c40 = arith.constant 40 : index
    %c0_8 = arith.constant 0 : index
    %12 = vector.load %arg8[%c40, %c0_8] : memref<72x768xf32, #tpu.memory_space<vmem>>, vector<8x768xf32>
    tpu.vector_store %arg8[%c40, %c0_8], %11 {strides = array<i32>} : memref<72x768xf32, #tpu.memory_space<vmem>>, vector<8x768xf32>,
    %c745_i32 = arith.constant 745 : i32
    %13 = tpu.dynamic_rotate %1 by %c745_i32 dim 1 : vector<8x768xf32>, i32 -> vector<8x768xf32>
    %c48 = arith.constant 48 : index
    %c0_9 = arith.constant 0 : index
    %14 = vector.load %arg8[%c48, %c0_9] : memref<72x768xf32, #tpu.memory_space<vmem>>, vector<8x768xf32>
    tpu.vector_store %arg8[%c48, %c0_9], %13 {strides = array<i32>} : memref<72x768xf32, #tpu.memory_space<vmem>>, vector<8x768xf32>,
    %c744_i32 = arith.constant 744 : i32
    %15 = tpu.dynamic_rotate %1 by %c744_i32 dim 1 : vector<8x768xf32>, i32 -> vector<8x768xf32>
    %c56 = arith.constant 56 : index
    %c0_10 = arith.constant 0 : index
    %16 = vector.load %arg8[%c56, %c0_10] : memref<72x768xf32, #tpu.memory_space<vmem>>, vector<8x768xf32>
    tpu.vector_store %arg8[%c56, %c0_10], %15 {strides = array<i32>} : memref<72x768xf32, #tpu.memory_space<vmem>>, vector<8x768xf32>,
    %c743_i32 = arith.constant 743 : i32
    %17 = tpu.dynamic_rotate %1 by %c743_i32 dim 1 : vector<8x768xf32>, i32 -> vector<8x768xf32>
    %c64 = arith.constant 64 : index
    %c0_11 = arith.constant 0 : index
    %18 = vector.load %arg8[%c64, %c0_11] : memref<72x768xf32, #tpu.memory_space<vmem>>, vector<8x768xf32>
    tpu.vector_store %arg8[%c64, %c0_11], %17 {strides = array<i32>} : memref<72x768xf32, #tpu.memory_space<vmem>>, vector<8x768xf32>,
    %c0_12 = arith.constant 0 : index
    %c0_13 = arith.constant 0 : index
    %19 = vector.load %arg2[%c0_12, %c0_13] : memref<8x72xf32, #tpu.memory_space<vmem>>, vector<8x72xf32>
    %c0_14 = arith.constant 0 : index
    %c0_15 = arith.constant 0 : index
    %20 = vector.load %arg8[%c0_14, %c0_15] : memref<72x768xf32, #tpu.memory_space<vmem>>, vector<72x768xf32>
    %cst = arith.constant dense<0.000000e+00> : vector<8x768xf32>
    %21 = tpu.matmul %19, %20, %cst {dimension_numbers = #tpu.dot_dimension_numbers<[1], [0], [0], [1], [0, 0, 1, 1], [], []>} : vector<8x72xf32>, vector<72x768xf32>, vector<8x768xf32> -> vector<8x768xf32>
    %c0_16 = arith.constant 0 : index
    %c0_17 = arith.constant 0 : index
    %22 = vector.load %arg4[%c0_16, %c0_17] : memref<8x1xf32, #tpu.memory_space<vmem>>, vector<8x1xf32>
    %23 = vector.broadcast %22 : vector<8x1xf32> to vector<8x768xf32>
    %24 = arith.addf %21, %23 : vector<8x768xf32>
    %cst_18 = arith.constant 0.000000e+00 : f32
    %25 = vector.broadcast %cst_18 : f32 to vector<8x768xf32>
    %26 = arith.maximumf %24, %25 : vector<8x768xf32>
    %c0_19 = arith.constant 0 : index
    %c0_20 = arith.constant 0 : index
    %27 = vector.load %arg6[%c0_19, %c0_20] : memref<1x768xf32, #tpu.memory_space<vmem>>, vector<1x768xf32>
    %28 = vector.broadcast %27 : vector<1x768xf32> to vector<8x768xf32>
    %29 = arith.mulf %26, %28 : vector<8x768xf32>
    %c25_i32_21 = arith.constant 25 : i32
    %30 = tpu.dynamic_rotate %29 by %c25_i32_21 dim 1 : vector<8x768xf32>, i32 -> vector<8x768xf32>
    %c0_22 = arith.constant 0 : index
    %c0_23 = arith.constant 0 : index
    %31 = vector.load %arg8[%c0_22, %c0_23] : memref<72x768xf32, #tpu.memory_space<vmem>>, vector<8x768xf32>
    tpu.vector_store %arg8[%c0_22, %c0_23], %30 {strides = array<i32>} : memref<72x768xf32, #tpu.memory_space<vmem>>, vector<8x768xf32>,
    %c24_i32_24 = arith.constant 24 : i32
    %32 = tpu.dynamic_rotate %29 by %c24_i32_24 dim 1 : vector<8x768xf32>, i32 -> vector<8x768xf32>
    %c8_25 = arith.constant 8 : index
    %c0_26 = arith.constant 0 : index
    %33 = vector.load %arg8[%c8_25, %c0_26] : memref<72x768xf32, #tpu.memory_space<vmem>>, vector<8x768xf32>
    tpu.vector_store %arg8[%c8_25, %c0_26], %32 {strides = array<i32>} : memref<72x768xf32, #tpu.memory_space<vmem>>, vector<8x768xf32>,
    %c23_i32_27 = arith.constant 23 : i32
    %34 = tpu.dynamic_rotate %29 by %c23_i32_27 dim 1 : vector<8x768xf32>, i32 -> vector<8x768xf32>
    %c16_28 = arith.constant 16 : index
    %c0_29 = arith.constant 0 : index
    %35 = vector.load %arg8[%c16_28, %c0_29] : memref<72x768xf32, #tpu.memory_space<vmem>>, vector<8x768xf32>
    tpu.vector_store %arg8[%c16_28, %c0_29], %34 {strides = array<i32>} : memref<72x768xf32, #tpu.memory_space<vmem>>, vector<8x768xf32>,
    %c1_i32_30 = arith.constant 1 : i32
    %36 = tpu.dynamic_rotate %29 by %c1_i32_30 dim 1 : vector<8x768xf32>, i32 -> vector<8x768xf32>
    %c24_31 = arith.constant 24 : index
    %c0_32 = arith.constant 0 : index
    %37 = vector.load %arg8[%c24_31, %c0_32] : memref<72x768xf32, #tpu.memory_space<vmem>>, vector<8x768xf32>
    tpu.vector_store %arg8[%c24_31, %c0_32], %36 {strides = array<i32>} : memref<72x768xf32, #tpu.memory_space<vmem>>, vector<8x768xf32>,
    %c32_33 = arith.constant 32 : index
    %c0_34 = arith.constant 0 : index
    %38 = vector.load %arg8[%c32_33, %c0_34] : memref<72x768xf32, #tpu.memory_space<vmem>>, vector<8x768xf32>
    tpu.vector_store %arg8[%c32_33, %c0_34], %29 {strides = array<i32>} : memref<72x768xf32, #tpu.memory_space<vmem>>, vector<8x768xf32>,
    %c767_i32_35 = arith.constant 767 : i32
    %39 = tpu.dynamic_rotate %29 by %c767_i32_35 dim 1 : vector<8x768xf32>, i32 -> vector<8x768xf32>
    %c40_36 = arith.constant 40 : index
    %c0_37 = arith.constant 0 : index
    %40 = vector.load %arg8[%c40_36, %c0_37] : memref<72x768xf32, #tpu.memory_space<vmem>>, vector<8x768xf32>
    tpu.vector_store %arg8[%c40_36, %c0_37], %39 {strides = array<i32>} : memref<72x768xf32, #tpu.memory_space<vmem>>, vector<8x768xf32>,
    %c745_i32_38 = arith.constant 745 : i32
    %41 = tpu.dynamic_rotate %29 by %c745_i32_38 dim 1 : vector<8x768xf32>, i32 -> vector<8x768xf32>
    %c48_39 = arith.constant 48 : index
    %c0_40 = arith.constant 0 : index
    %42 = vector.load %arg8[%c48_39, %c0_40] : memref<72x768xf32, #tpu.memory_space<vmem>>, vector<8x768xf32>
    tpu.vector_store %arg8[%c48_39, %c0_40], %41 {strides = array<i32>} : memref<72x768xf32, #tpu.memory_space<vmem>>, vector<8x768xf32>,
    %c744_i32_41 = arith.constant 744 : i32
    %43 = tpu.dynamic_rotate %29 by %c744_i32_41 dim 1 : vector<8x768xf32>, i32 -> vector<8x768xf32>
    %c56_42 = arith.constant 56 : index
    %c0_43 = arith.constant 0 : index
    %44 = vector.load %arg8[%c56_42, %c0_43] : memref<72x768xf32, #tpu.memory_space<vmem>>, vector<8x768xf32>
    tpu.vector_store %arg8[%c56_42, %c0_43], %43 {strides = array<i32>} : memref<72x768xf32, #tpu.memory_space<vmem>>, vector<8x768xf32>,
    %c743_i32_44 = arith.constant 743 : i32
    %45 = tpu.dynamic_rotate %29 by %c743_i32_44 dim 1 : vector<8x768xf32>, i32 -> vector<8x768xf32>
    %c64_45 = arith.constant 64 : index
    %c0_46 = arith.constant 0 : index
    %46 = vector.load %arg8[%c64_45, %c0_46] : memref<72x768xf32, #tpu.memory_space<vmem>>, vector<8x768xf32>
    tpu.vector_store %arg8[%c64_45, %c0_46], %45 {strides = array<i32>} : memref<72x768xf32, #tpu.memory_space<vmem>>, vector<8x768xf32>,
    %c0_47 = arith.constant 0 : index
    %c0_48 = arith.constant 0 : index
    %47 = vector.load %arg3[%c0_47, %c0_48] : memref<8x72xf32, #tpu.memory_space<vmem>>, vector<8x72xf32>
    %c0_49 = arith.constant 0 : index
    %c0_50 = arith.constant 0 : index
    %48 = vector.load %arg8[%c0_49, %c0_50] : memref<72x768xf32, #tpu.memory_space<vmem>>, vector<72x768xf32>
    %cst_51 = arith.constant dense<0.000000e+00> : vector<8x768xf32>
    %49 = tpu.matmul %47, %48, %cst_51 {dimension_numbers = #tpu.dot_dimension_numbers<[1], [0], [0], [1], [0, 0, 1, 1], [], []>} : vector<8x72xf32>, vector<72x768xf32>, vector<8x768xf32> -> vector<8x768xf32>
    %c0_52 = arith.constant 0 : index
    %c0_53 = arith.constant 0 : index
    %50 = vector.load %arg5[%c0_52, %c0_53] : memref<8x1xf32, #tpu.memory_space<vmem>>, vector<8x1xf32>
    %51 = vector.broadcast %50 : vector<8x1xf32> to vector<8x768xf32>
    %52 = arith.addf %49, %51 : vector<8x768xf32>
    %cst_54 = arith.constant 0.000000e+00 : f32
    %53 = vector.broadcast %cst_54 : f32 to vector<8x768xf32>
    %54 = arith.maximumf %52, %53 : vector<8x768xf32>
    %c0_55 = arith.constant 0 : index
    %c0_56 = arith.constant 0 : index
    %c0_57 = arith.constant 0 : index
    %55 = vector.load %arg7[%c0_55, %c0_56, %c0_57] : memref<1x8x768xf32, #tpu.memory_space<vmem>>, vector<1x8x768xf32>
    %56 = vector.shape_cast %55 : vector<1x8x768xf32> to vector<8x768xf32>
    %57 = vector.shape_cast %54 : vector<8x768xf32> to vector<1x8x768xf32>
    tpu.vector_store %arg7[%c0_55, %c0_56, %c0_57], %57 {strides = array<i32>} : memref<1x8x768xf32, #tpu.memory_space<vmem>>, vector<1x8x768xf32>,
    return
  }
  func.func @transform_0(%arg0: i32) -> (i32, i32, i32) {
    %c0_i32 = arith.constant 0 : i32
    %c0_i32_0 = arith.constant 0 : i32
    %c0_i32_1 = arith.constant 0 : i32
    return %arg0, %c0_i32, %c0_i32_0 : i32, i32, i32
  }
  func.func @transform_1(%arg0: i32) -> (i32, i32) {
    %c0_i32 = arith.constant 0 : i32
    %c0_i32_0 = arith.constant 0 : i32
    %c0_i32_1 = arith.constant 0 : i32
    return %c0_i32, %c0_i32_0 : i32, i32
  }
  func.func @transform_2(%arg0: i32) -> (i32, i32) {
    %c0_i32 = arith.constant 0 : i32
    %c0_i32_0 = arith.constant 0 : i32
    %c0_i32_1 = arith.constant 0 : i32
    return %c0_i32, %c0_i32_0 : i32, i32
  }
  func.func @transform_3(%arg0: i32) -> (i32, i32) {
    %c0_i32 = arith.constant 0 : i32
    %c0_i32_0 = arith.constant 0 : i32
    %c0_i32_1 = arith.constant 0 : i32
    return %c0_i32, %c0_i32_0 : i32, i32
  }
  func.func @transform_4(%arg0: i32) -> (i32, i32) {
    %c0_i32 = arith.constant 0 : i32
    %c0_i32_0 = arith.constant 0 : i32
    %c0_i32_1 = arith.constant 0 : i32
    return %c0_i32, %c0_i32_0 : i32, i32
  }
  func.func @transform_5(%arg0: i32) -> (i32, i32) {
    %c0_i32 = arith.constant 0 : i32
    %c0_i32_0 = arith.constant 0 : i32
    %c0_i32_1 = arith.constant 0 : i32
    return %c0_i32, %c0_i32_0 : i32, i32
  }
  func.func @transform_6(%arg0: i32) -> (i32, i32, i32) {
    %c0_i32 = arith.constant 0 : i32
    %c0_i32_0 = arith.constant 0 : i32
    %c0_i32_1 = arith.constant 0 : i32
    return %arg0, %c0_i32, %c0_i32_0 : i32, i32, i32
  }
}

</mosaic_0001>

<bundles_post_ra>
// kernel: deconv_forward.1
= control target key start
LH: loop header
LB: loop body
LE: loop exit
PB: predicated region body
PF: predicated region fallthrough
CT: control target
= control target key end

     0   :  { %s1690_s21 = smov 0   ;;  %s2312_s0 = inlined_call_operand.vmem [shape: f32[2,8,768], index: 0, kind: input, shape index: {}]   ;;  %s2313_s1 = inlined_call_operand.vmem [shape: f32[8,72], index: 1, kind: input, shape index: {}]   ;;  %s2314_s2 = inlined_call_operand.vmem [shape: f32[8,72], index: 2, kind: input, shape index: {}]   ;;  %s2315_s3 = inlined_call_operand.vmem [shape: f32[8,1], index: 3, kind: input, shape index: {}]   ;;  %s2316_s4 = inlined_call_operand.vmem [shape: f32[8,1], index: 4, kind: input, shape index: {}]   ;;  %s2317_s5 = inlined_call_operand.vmem [shape: f32[1,768], index: 5, kind: input, shape index: {}]   ;;  %s2318_s6 = inlined_call_operand.vmem [shape: f32[2,8,768], index: 6, kind: output, shape index: {}]  }
   0x1 LB: > { %s1330_s22 = sadd.s32 4294967295, %s1643_s21   ;;  %p1334_p0 = scmp.ge.s32.totalorder %s1643_s21, 1  ;;  %s1643_s21 = sphi %s1690_s21, %s16_s21  }
   0x2   : > { %p212_p1 = scmp.lt.s32.totalorder %s1643_s21, 3 }
   0x4   : > { %p213_p2 = pnand %p1334_p0, %p212_p1 }
   0x5   : > { %p242_p3 = scmp.lt.s32.totalorder (!%p213_p2), %s1330_s22, 1  ;;  %s1645_s27 = smov (!%p213_p2), 25   ;;  %v1652_v9 = vmov (!%p213_p2), 0.0   ;;  %v1654_v11 = vmov (!%p213_p2), 0   ;;  %v521_v12 = vld [vmem:[%s2315_s3] sm:$0xff] (!%p213_p2)  ;;  %v270_v13 = vlaneseq (!%p213_p2)  ;;  %vm527_vm8 = vcmask (!%p213_p2), 588800  }
   0x6   : > { %216 = sbr.rel (%p213_p2) target bundleno = 807 (0x327), region = 44  ;;  %s1646_s28 = smov (!%p213_p2), 24   ;;  %595 = vmatprep.mubr.f32.mxu0 (!%p213_p2), %v1652_v9  ;;  %666 = vmatprep.mubr.f32.mxu1 (!%p213_p2), %v1652_v9 }
   0x7   : > { %s1647_s29 = smov (!%p213_p2), 1   ;;  %s1648_s30 = smov (!%p213_p2), 23   ;;  %1550 = vset.pattern.permute.xlu0 (!%p213_p2), %v1654_v11  ;;  %1636 = vset.pattern.permute.xlu1 (!%p213_p2), %v1654_v11  ;;  %v1786_v16 = vand.u32 (!%p213_p2), 127, %v270_v13 }
   0x8   : > { %s1649_s7 = smov (!%p213_p2), 127   ;;  %s1650_s8 = smov (!%p213_p2), 104  }
   0x9   : > { %s1651_s9 = smov (!%p213_p2), 105   ;;  %s1653_s10 = smov (!%p213_p2), 103   ;;  %vm272_vm0 = vcmp.lt.s32.totalorder (!%p213_p2), %v1786_v16, 25  ;;  %vm297_vm1 = vcmp.lt.s32.totalorder (!%p213_p2), %v1786_v16, 24  ;;  %vm322_vm2 = vcmp.lt.s32.totalorder (!%p213_p2), %v1786_v16, 23  ;;  %vm347_vm3 = vcmp.lt.s32.totalorder (!%p213_p2), %v1786_v16, 1 }
   0xa   : > { %vm378_vm4 = vcmp.lt.s32.totalorder (!%p213_p2), %v1786_v16, 127  ;;  %vm428_vm5 = vcmp.lt.s32.totalorder (!%p213_p2), %v1786_v16, 104  ;;  %vm403_vm6 = vcmp.lt.s32.totalorder (!%p213_p2), %v1786_v16, 105  ;;  %vm453_vm7 = vcmp.lt.s32.totalorder (!%p213_p2), %v1786_v16, 103 }
   0xd   : > { %s2320_s22 = smov (!%p242_p3, %s1330_s22), 1 }
   0xe   : > { %s1441_s23 = smul.u32 48, %s2320_s22 }
  0x10   : > { %s1706_s26 = scalar_lea.vmem %s2312_s0, %s1441_s23 }
  0x11   : > { %v1709_v0 = vld [vmem:[%s1706_s26 + $0x20] sm:$0xff]  ;;  %v1712_v1 = vld [vmem:[%s1706_s26 + $0x28] sm:$0xff]  ;;  %v1731_v6 = vld [vmem:[%s1706_s26 + $0x10] sm:$0xff] }
  0x12   : > { %v1715_v2 = vld [vmem:[%s1706_s26] sm:$0xff]  ;;  %v1470_v3 = vpack.i.bf16 %v1709_v0, %v1712_v1  ;;  %v1720_v4 = vld [vmem:[%s1706_s26 + $0x8] sm:$0xff]  ;;  %v1747_v8 = vld [vmem:[%s1706_s26 + $0x18] sm:$0xff]  ;;  %s251_s26 = scalar_lea.vmem %s2318_s6, %s1441_s23 }
  0x13   : > { %v1460_v5 = vpack.i.bf16 %v1720_v4, %v1715_v2  ;;  %v1500_v7 = vpack.i.bf16 %v1731_v6, %v1720_v4  ;;  %v1520_v10 = vpack.i.bf16 %v1731_v6, %v1747_v8 }
  0x14   : > { %1471 = vrot.lane.b32.xlu1 %v1470_v3, %s1645_s27 }
  0x15   : > { %1461 = vrot.lane.b32.xlu0 %v1460_v5, %s1645_s27 }
  0x18   : > { %1476 = vrot.lane.b32.xlu1 %v1470_v3, %s1646_s28 }
  0x19   : > { %1466 = vrot.lane.b32.xlu0 %v1460_v5, %s1646_s28 }
  0x1c   : > { %1486 = vrot.lane.b32.xlu1 %v1460_v5, %s1647_s29 }
  0x1d   : > { %1481 = vrot.lane.b32.xlu0 %v1460_v5, %s1648_s30 }
  0x20   : > { %1496 = vrot.lane.b32.xlu1 %v1470_v3, %s1647_s29 }
  0x21   : > { %1491 = vrot.lane.b32.xlu0 %v1470_v3, %s1648_s30 }
  0x24   : > { %366 = vrot.lane.b32.xlu1 %v1715_v2, %s1649_s7 }
  0x25   : > { %1501 = vrot.lane.b32.xlu0 %v1500_v7, %s1649_s7 }
  0x28   : > { %1511 = vrot.lane.b32.xlu1 %v1500_v7, %s1650_s8 }
  0x29   : > { %1506 = vrot.lane.b32.xlu0 %v1500_v7, %s1651_s9 }
  0x2c   : > { %416 = vrot.lane.b32.xlu1 %v1715_v2, %s1650_s8 }
  0x2d   : > { %391 = vrot.lane.b32.xlu0 %v1715_v2, %s1651_s9 }
  0x30   : > { %445 = vrot.lane.b32.xlu1 %v1731_v6, %s1653_s10 }
  0x31   : > { %443 = vrot.lane.b32.xlu0 %v1720_v4, %s1653_s10 }
  0x34   : > { %1521 = vrot.lane.b32.xlu1 %v1520_v10, %s1646_s28 }
  0x35   : > { %1516 = vrot.lane.b32.xlu0 %v1520_v10, %s1645_s27 }
  0x38   : > { %1526 = vrot.lane.b32.xlu1 %v1520_v10, %s1648_s30 }
  0x39   : > { %441 = vrot.lane.b32.xlu0 %v1715_v2, %s1653_s10 }
  0x3c   : > { %1536 = vrot.lane.b32.xlu1 %v1470_v3, %s1649_s7 }
  0x3d   : > { %1531 = vrot.lane.b32.xlu0 %v1520_v10, %s1647_s29 }
  0x40   : > { %1546 = vrot.lane.b32.xlu1 %v1470_v3, %s1650_s8 }
  0x41   : > { %1541 = vrot.lane.b32.xlu0 %v1470_v3, %s1651_s9 }
  0x44   : > { %451 = vrot.lane.b32.xlu1 %v1712_v1, %s1653_s10 }
  0x45   : > { %372 = vrot.lane.b32.xlu0 %v1747_v8, %s1649_s7 }
  0x48   : > { %397 = vrot.lane.b32.xlu1 %v1747_v8, %s1651_s9 }
  0x49   : > { %449 = vrot.lane.b32.xlu0 %v1709_v0, %s1653_s10 }
  0x4c   : > { %447 = vrot.lane.b32.xlu1 %v1747_v8, %s1653_s10 }
  0x4d   : > { %422 = vrot.lane.b32.xlu0 %v1747_v8, %s1650_s8 }
  0x51   : > { %524 = vperm.xlu0 %1550, %v521_v12  }
  0x86   : > { %v1781_v14 = vpop.permute.xlu1 %1471 }
  0x87   : > { %v1783_v15 = vpop.permute.xlu0 %1461  ;;  %v1473_v17 = vunpack.i.l.bf16 %v1781_v14  ;;  %v1474_v11 = vunpack.i.h.bf16 %v1781_v14 }
  0x88   : > { %v1464_v18 = vunpack.i.h.bf16 %v1783_v15  ;;  %v1463_v19 = vunpack.i.l.bf16 %v1783_v15  ;;  %v1934_v15 = vld [vmem:[%s2313_s1] sm:$0xff] }
  0x8a   : > { %v1791_v20 = vpop.permute.xlu1 %1476  ;;  %v277_v26 = vsel %vm272_vm0, %v1463_v19, %v1464_v18  ;;  %v278_v28 = vsel %vm272_vm0, %v1473_v17, %v1463_v19 }
  0x8b   : > { %v1478_v21 = vunpack.i.l.bf16 %v1791_v20  ;;  %v1794_v22 = vpop.permute.xlu0 %1466  ;;  %v1479_v12 = vunpack.i.h.bf16 %v1791_v20 }
  0x8c   : > { %v1469_v23 = vunpack.i.h.bf16 %v1794_v22  ;;  %v1468_v24 = vunpack.i.l.bf16 %v1794_v22 }
  0x8e   : > { %v1802_v25 = vpop.permute.xlu1 %1486  ;;  %v302_v27 = vsel %vm297_vm1, %v1468_v24, %v1469_v23  ;;  %v303_v29 = vsel %vm297_vm1, %v1478_v21, %v1468_v24 }
  0x8f   : > { %v1489_v30 = vunpack.i.h.bf16 %v1802_v25  ;;  %v1488_v31 = vunpack.i.l.bf16 %v1802_v25  ;;  %v1822_v32 = vpop.permute.xlu0 %1481  ;;  %v1345_v33 = vpack.c.bf16 %v302_v27, %v277_v26  ;;  %v1347_v34 = vpack.c.bf16 %v303_v29, %v278_v28 }
  0x90   : > { %v1484_v35 = vunpack.i.h.bf16 %v1822_v32  ;;  %v1483_v36 = vunpack.i.l.bf16 %v1822_v32 }
  0x91   : > { %1346 = vmatprep.subr.bf16.mxu0 %v1345_v33  ;;  %v352_v37 = vsel %vm347_vm3, %v1488_v31, %v1489_v30  ;;  %v298_v33 = vsel %vm297_vm1, %v1479_v12, %v1478_v21 }
  0x92   : > { %1348 = vmatpush1.bf16.msra.mxu0 %v1347_v34  ;;  %v1830_v38 = vpop.permute.xlu1 %1496  ;;  %v327_v39 = vsel %vm322_vm2, %v1483_v36, %v1484_v35 }
  0x93   : > { %v1498_v40 = vunpack.i.l.bf16 %v1830_v38  ;;  %v1837_v41 = vpop.permute.xlu0 %1491  ;;  %v1349_v42 = vpack.c.bf16 %v352_v37, %v327_v39  ;;  %v1499_v34 = vunpack.i.h.bf16 %v1830_v38 }
  0x94   : > { %v1493_v43 = vunpack.i.l.bf16 %v1837_v41 }
  0x95   : > { %1350 = vmatprep.subr.bf16.mxu0 %v1349_v42  ;;  %v353_v44 = vsel %vm347_vm3, %v1498_v40, %v1488_v31  ;;  %v273_v31 = vsel %vm272_vm0, %v1474_v11, %v1473_v17 }
  0x96   : > { %v1844_v45 = vpop.permute.xlu1 %366  ;;  %v328_v46 = vsel %vm322_vm2, %v1493_v43, %v1483_v36  ;;  %v1494_v36 = vunpack.i.h.bf16 %v1837_v41 }
  0x97   : > { %v1850_v47 = vpop.permute.xlu0 %1501  ;;  %v1351_v48 = vpack.c.bf16 %v353_v44, %v328_v46 }
  0x98   : > { %v1504_v49 = vunpack.i.h.bf16 %v1850_v47  ;;  %v1503_v50 = vunpack.i.l.bf16 %v1850_v47 }
  0x99   : > { %1352 = vmatpush1.bf16.msra.mxu0 %v1351_v48 }
  0x9a   : > { %v1855_v51 = vpop.permute.xlu1 %1511  ;;  %v382_v52 = vsel %vm378_vm4, %v1503_v50, %v1504_v49  ;;  %v383_v53 = vsel %vm378_vm4, %v1844_v45, %v1503_v50 }
  0x9b   : > { %v1514_v54 = vunpack.i.h.bf16 %v1855_v51  ;;  %v1513_v55 = vunpack.i.l.bf16 %v1855_v51  ;;  %v1868_v56 = vpop.permute.xlu0 %1506  ;;  %v1353_v57 = vpack.c.bf16 %v382_v52, %v1720_v4  ;;  %v1355_v58 = vpack.c.bf16 %v383_v53, %v1715_v2 }
  0x9c   : > { %v1509_v59 = vunpack.i.h.bf16 %v1868_v56  ;;  %v1508_v60 = vunpack.i.l.bf16 %v1868_v56  ;;  %v348_v53 = vsel %vm347_vm3, %v1499_v34, %v1498_v40 }
  0x9d   : > { %1354 = vmatprep.subr.bf16.mxu0 %v1353_v57  ;;  %v432_v61 = vsel %vm428_vm5, %v1513_v55, %v1514_v54 }
  0x9e   : > { %1356 = vmatpush1.bf16.msra.mxu0 %v1355_v58  ;;  %v1878_v62 = vpop.permute.xlu1 %416  ;;  %v407_v63 = vsel %vm403_vm6, %v1508_v60, %v1509_v59 }
  0x9f   : > { %v433_v2 = vsel %vm428_vm5, %v1878_v62, %v1513_v55  ;;  %v1887_v3 = vpop.permute.xlu0 %391  ;;  %v1357_v4 = vpack.c.bf16 %v432_v61, %v407_v63 }
  0xa0   : > { %v408_v5 = vsel %vm403_vm6, %v1887_v3, %v1508_v60 }
  0xa1   : > { %v1359_v7 = vpack.c.bf16 %v433_v2, %v408_v5  ;;  %1358 = vmatprep.subr.bf16.mxu0 %v1357_v4 }
  0xa2   : > { %v1893_v10 = vpop.permute.xlu1 %445 }
  0xa3   : > { %v444_v19 = vpop.permute.xlu0 %443  ;;  %1360 = vmatpush1.bf16.msra.mxu0 %v1359_v7 }
  0xa4   : > { %v457_v24 = vsel %vm453_vm7, %v444_v19, %v1893_v10 }
  0xa5   : > { %547 = vmatprep.subr.mxu0 %v457_v24 }
  0xa6   : > { %v1522_v26 = vpop.permute.xlu1 %1521 }
  0xa7   : > { %v1524_v27 = vunpack.i.h.bf16 %v1522_v26  ;;  %v1523_v28 = vunpack.i.l.bf16 %v1522_v26  ;;  %v1517_v29 = vpop.permute.xlu0 %1516 }
  0xa8   : > { %v1519_v37 = vunpack.i.h.bf16 %v1517_v29  ;;  %v1518_v39 = vunpack.i.l.bf16 %v1517_v29 }
  0xa9   : > { %v300_v42 = vsel %vm297_vm1, %v1524_v27, %v1523_v28  ;;  %v301_v14 = vsel %vm297_vm1, %v1469_v23, %v1524_v27  ;;  %v299_v44 = vsel %vm297_vm1, %v1523_v28, %v1479_v12  ;;  %v1377_v23 = vpack.c.bf16 %v298_v33, %v273_v31 }
  0xaa   : > { %v1527_v17 = vpop.permute.xlu1 %1526  ;;  %v275_v20 = vsel %vm272_vm0, %v1519_v37, %v1518_v39  ;;  %v276_v21 = vsel %vm272_vm0, %v1464_v18, %v1519_v37  ;;  %v274_v46 = vsel %vm272_vm0, %v1518_v39, %v1474_v11  ;;  %v323_v18 = vsel %vm322_vm2, %v1494_v36, %v1493_v43 }
  0xab   : > { %v1926_v22 = vpop.permute.xlu0 %441  ;;  %v1361_v48 = vpack.c.bf16 %v300_v42, %v275_v20  ;;  %v1363_v52 = vpack.c.bf16 %v301_v14, %v276_v21  ;;  %v1529_v55 = vunpack.i.h.bf16 %v1527_v17  ;;  %v1528_v57 = vunpack.i.l.bf16 %v1527_v17 }
  0xac   : > { %v458_v50 = vsel %vm453_vm7, %v1926_v22, %v444_v19  ;;  %v1379_v58 = vpack.c.bf16 %v299_v44, %v274_v46  ;;  %v1381_v41 = vpack.c.bf16 %v348_v53, %v323_v18  ;;  %v750_v53 = vld [vmem:[%s2317_s5] sm:$0x3f] }
  0xad   : > { %548 = vmatpush1.msra.mxu0 %v458_v50  ;;  %1362 = vmatprep.subr.bf16.mxu1 %v1361_v48  ;;  %v325_v40 = vsel %vm322_vm2, %v1529_v55, %v1528_v57  ;;  %v324_v4 = vsel %vm322_vm2, %v1528_v57, %v1494_v36  ;;  %v326_v5 = vsel %vm322_vm2, %v1484_v35, %v1529_v55 }
  0xae   : > { %1364 = vmatpush1.bf16.msra.mxu1 %v1363_v52  ;;  %1378 = vmatprep.subr.bf16.mxu0 %v1377_v23  ;;  %v1537_v60 = vpop.permute.xlu1 %1536 }
  0xaf   : > { %v1539_v61 = vunpack.i.h.bf16 %v1537_v60  ;;  %v1538_v63 = vunpack.i.l.bf16 %v1537_v60  ;;  %v1532_v2 = vpop.permute.xlu0 %1531  ;;  %1337 = vmatmul.mubr.msk.f32.vlgmr.msra.gmra.mrb[0].mxu0 %vm527_vm8, %v1934_v15 }
  0xb0   : > { %v1534_v43 = vunpack.i.h.bf16 %v1532_v2  ;;  %v1533_v38 = vunpack.i.l.bf16 %v1532_v2  ;;  %1380 = vmatpush1.bf16.msra.mxu0 %v1379_v58  ;;  %737 = vmatprep.mubr.f32.mxu0 %v1652_v9 }
  0xb1   : > { %1382 = vmatprep.subr.bf16.mxu0 %v1381_v41  ;;  %v384_v7 = vsel %vm378_vm4, %v1538_v63, %v1844_v45  ;;  %v379_v11 = vsel %vm378_vm4, %v1539_v61, %v1538_v63 }
  0xb2   : > { %v349_v12 = vsel %vm347_vm3, %v1533_v38, %v1499_v34  ;;  %v1547_v19 = vpop.permute.xlu1 %1546  ;;  %v350_v24 = vsel %vm347_vm3, %v1534_v43, %v1533_v38  ;;  %v351_v32 = vsel %vm347_vm3, %v1489_v30, %v1534_v43  ;;  %v1385_v36 = vpack.c.bf16 %v384_v7, %v1712_v1 }
  0xb3   : > { %v1383_v35 = vpack.c.bf16 %v349_v12, %v324_v4  ;;  %v1549_v26 = vunpack.i.h.bf16 %v1547_v19  ;;  %v1548_v27 = vunpack.i.l.bf16 %v1547_v19  ;;  %v1542_v28 = vpop.permute.xlu0 %1541  ;;  %v1365_v45 = vpack.c.bf16 %v350_v24, %v325_v40 }
  0xb4   : > { %v1544_v29 = vunpack.i.h.bf16 %v1542_v28  ;;  %v1543_v31 = vunpack.i.l.bf16 %v1542_v28  ;;  %v1367_v33 = vpack.c.bf16 %v351_v32, %v326_v5  ;;  %v1387_v34 = vpack.c.bf16 %v379_v11, %v1709_v0 }
  0xb5   : > { %1366 = vmatprep.subr.bf16.mxu1 %v1365_v45  ;;  %1384 = vmatpush1.bf16.msra.mxu0 %v1383_v35  ;;  %v434_v25 = vsel %vm428_vm5, %v1548_v27, %v1878_v62  ;;  %v429_v1 = vsel %vm428_vm5, %v1549_v26, %v1548_v27 }
  0xb6   : > { %1368 = vmatpush1.bf16.msra.mxu1 %v1367_v33  ;;  %1386 = vmatprep.subr.bf16.mxu0 %v1385_v36  ;;  %v452_v30 = vpop.permute.xlu1 %451  ;;  %v409_v37 = vsel %vm403_vm6, %v1543_v31, %v1887_v3  ;;  %v404_v0 = vsel %vm403_vm6, %v1544_v29, %v1543_v31 }
  0xb7   : > { %v373_v39 = vpop.permute.xlu0 %372  ;;  %v1389_v42 = vpack.c.bf16 %v434_v25, %v409_v37  ;;  %v1391_v20 = vpack.c.bf16 %v429_v1, %v404_v0  ;;  %v459_v46 = vsel %vm453_vm7, %v452_v30, %v1926_v22 }
  0xb8   : > { %v380_v14 = vsel %vm378_vm4, %v373_v39, %v1539_v61  ;;  %v381_v62 = vsel %vm378_vm4, %v1504_v49, %v373_v39 }
  0xb9   : > { %v1369_v17 = vpack.c.bf16 %v380_v14, %v1747_v8  ;;  %v1371_v3 = vpack.c.bf16 %v381_v62, %v1731_v6  ;;  %1388 = vmatpush1.bf16.msra.mxu0 %v1387_v34  ;;  %v1041_v62 = vld [vmem:[%s2316_s4] sm:$0xff] }
  0xba   : > { %1390 = vmatprep.subr.bf16.mxu0 %v1389_v42  ;;  %v398_v21 = vpop.permute.xlu1 %397 }
  0xbb   : > { %v450_v44 = vpop.permute.xlu0 %449  ;;  %1370 = vmatprep.subr.bf16.mxu1 %v1369_v17  ;;  %v405_v47 = vsel %vm403_vm6, %v398_v21, %v1544_v29  ;;  %v406_v6 = vsel %vm403_vm6, %v1509_v59, %v398_v21 }
  0xbc   : > { %1372 = vmatpush1.bf16.msra.mxu1 %v1371_v3  ;;  %v454_v8 = vsel %vm453_vm7, %v450_v44, %v452_v30 }
  0xbd   : > { %1392 = vmatpush1.bf16.msra.mxu0 %v1391_v20 }
  0xbe   : > { %689 = vmatprep.subr.mxu0 %v459_v46  ;;  %v448_v23 = vpop.permute.xlu1 %447 }
  0xbf   : > { %v423_v49 = vpop.permute.xlu0 %422  ;;  %v455_v56 = vsel %vm453_vm7, %v448_v23, %v450_v44  ;;  %v456_v51 = vsel %vm453_vm7, %v1893_v10, %v448_v23 }
  0xc0   : > { %v430_v48 = vsel %vm428_vm5, %v423_v49, %v1549_v26  ;;  %v431_v22 = vsel %vm428_vm5, %v1514_v54, %v423_v49  ;;  %v753_v54 = vshrl.u32 %v270_v13, 7 }
  0xc1   : > { %v1373_v50 = vpack.c.bf16 %v430_v48, %v405_v47  ;;  %v1375_v52 = vpack.c.bf16 %v431_v22, %v406_v6  ;;  %690 = vmatpush1.msra.mxu0 %v454_v8 }
  0xc2   : > { %1339 = vmatmul.mubr.msk.f32.vlgmr.msra.gmra.mrb[2].mxu0 %vm527_vm8, %v1934_v15  ;;  %v754_v59 = vsub.s32 0, %v753_v54  ;;  %v758_v55 = vsub.s32 1, %v753_v54  ;;  %v762_v4 = vsub.s32 2, %v753_v54  ;;  %v774_v11 = vsub.s32 5, %v753_v54 }
  0xc3   : > { %1374 = vmatprep.subr.bf16.mxu1 %v1373_v50  ;;  %1185 = vmatprep.mubr.f32.mxu0 %v1652_v9  ;;  %v766_v26 = vsub.s32 3, %v753_v54  ;;  %v770_v27 = vsub.s32 4, %v753_v54 }
  0xc4   : > { %1376 = vmatpush1.bf16.msra.mxu1 %v1375_v52  ;;  %v755_v60 = vrot.slane %v750_v53, %v754_v59  ;;  %v759_v63 = vrot.slane %v750_v53, %v758_v55  ;;  %v763_v19 = vrot.slane %v750_v53, %v762_v4  ;;  %v775_v29 = vrot.slane %v750_v53, %v774_v11 }
  0xc5   : > { %618 = vmatprep.subr.mxu1 %v455_v56  ;;  %v767_v36 = vrot.slane %v750_v53, %v766_v26  ;;  %v771_v30 = vrot.slane %v750_v53, %v770_v27 }
  0xc8   : > { %619 = vmatpush1.msra.mxu1 %v456_v51 }
  0xc9   : > { %1338 = vmatmul.mubr.msk.f32.vlgmr.msra.gmra.mrb[0].mxu1 %vm527_vm8, %v1934_v15 }
  0xca   : > { %1114 = vmatprep.mubr.f32.mxu1 %v1652_v9 }
  0xd0   : > { %v525_v18 = vpop.permute.xlu0 %524 }
 0x182   : > { %v597_v57 = vpop.f32.mrb[0].mxu0 }
 0x183   : > { %v598_v58 = vadd.f32 %v597_v57, %v525_v18  ;;  %v599_v61 = vpop.f32.mrb[1].mxu0 }
 0x184   : > { %v600_v10 = vadd.f32 %v599_v61, %v525_v18 }
 0x185   : > { %v744_v2 = vmax.f32 %v598_v58, 0.0 }
 0x186   : > { %v745_v41 = vmax.f32 %v600_v10, 0.0 }
 0x187   : > { %v2020_v15 = vmul.f32 %v755_v60, %v744_v2 }
 0x188   : > { %v2022_v43 = vmul.f32 %v759_v63, %v745_v41 }
 0x189   : > { %890 = vrot.lane.b32.xlu1 %v2020_v15, %s1649_s7  ;;  %914 = vrot.lane.b32.xlu0 %v2020_v15, %s1651_s9 }
 0x18a   : > { %v1561_v13 = vpack.i.bf16 %v2022_v43, %v2020_v15 }
 0x18d   : > { %938 = vrot.lane.b32.xlu1 %v2020_v15, %s1650_s8  ;;  %1562 = vrot.lane.b32.xlu0 %v1561_v13, %s1648_s30 }
 0x191   : > { %1552 = vrot.lane.b32.xlu1 %v1561_v13, %s1645_s27 }
 0x195   : > { %v739_v38 = vpop.f32.mrb[2].mxu0  ;;  %1557 = vrot.lane.b32.xlu1 %v1561_v13, %s1646_s28 }
 0x196   : > { %v741_v40 = vpop.f32.mrb[3].mxu0  ;;  %v740_v28 = vadd.f32 %v739_v38, %v525_v18 }
 0x197   : > { %v742_v7 = vadd.f32 %v741_v40, %v525_v18 }
 0x198   : > { %v748_v25 = vmax.f32 %v740_v28, 0.0 }
 0x199   : > { %1567 = vrot.lane.b32.xlu1 %v1561_v13, %s1647_s29  ;;  %v749_v45 = vmax.f32 %v742_v7, 0.0 }
 0x19a   : > { %v2048_v1 = vmul.f32 %v771_v30, %v748_v25 }
 0x19b   : > { %v2040_v37 = vmul.f32 %v775_v29, %v749_v45 }
 0x19c   : > { %v668_v5 = vpop.f32.mrb[0].mxu1 }
 0x19d   : > { %v669_v12 = vadd.f32 %v668_v5, %v525_v18  ;;  %v670_v24 = vpop.f32.mrb[1].mxu1 }
 0x19e   : > { %v671_v35 = vadd.f32 %v670_v24, %v525_v18 }
 0x19f   : > { %v746_v32 = vmax.f32 %v669_v12, 0.0 }
 0x1a0   : > { %v747_v33 = vmax.f32 %v671_v35, 0.0 }
 0x1a1   : > { %v2036_v31 = vmul.f32 %v763_v19, %v746_v32 }
 0x1a2   : > { %v2044_v39 = vmul.f32 %v767_v36, %v747_v33 }
 0x1a3   : > { %v1571_v34 = vpack.i.bf16 %v2036_v31, %v2022_v43  ;;  %v1596_v42 = vpack.i.bf16 %v2036_v31, %v2040_v37 }
 0x1a4   : > { %v1586_v0 = vpack.i.bf16 %v2048_v1, %v2044_v39  ;;  %v1616_v14 = vpack.i.bf16 %v2044_v39, %v2036_v31 }
 0x1a5   : > { %1572 = vrot.lane.b32.xlu0 %v1571_v34, %s1649_s7  ;;  %1582 = vrot.lane.b32.xlu1 %v1571_v34, %s1650_s8 }
 0x1a9   : > { %1577 = vrot.lane.b32.xlu0 %v1571_v34, %s1651_s9  ;;  %1597 = vrot.lane.b32.xlu1 %v1596_v42, %s1646_s28 }
 0x1ad   : > { %1587 = vrot.lane.b32.xlu0 %v1586_v0, %s1645_s27  ;;  %870 = vrot.lane.b32.xlu1 %v2040_v37, %s1647_s29 }
 0x1b1   : > { %1592 = vrot.lane.b32.xlu0 %v1596_v42, %s1645_s27  ;;  %1607 = vrot.lane.b32.xlu1 %v1586_v0, %s1646_s28 }
 0x1b5   : > { %1602 = vrot.lane.b32.xlu0 %v1596_v42, %s1648_s30  ;;  %966 = vrot.lane.b32.xlu1 %v2036_v31, %s1653_s10 }
 0x1b9   : > { %964 = vrot.lane.b32.xlu0 %v2022_v43, %s1653_s10  ;;  %1612 = vrot.lane.b32.xlu1 %v1586_v0, %s1648_s30 }
 0x1bd   : > { %962 = vrot.lane.b32.xlu0 %v2020_v15, %s1653_s10  ;;  %868 = vrot.lane.b32.xlu1 %v2048_v1, %s1647_s29 }
 0x1c1   : > { %1617 = vrot.lane.b32.xlu0 %v1616_v14, %s1647_s29  ;;  %900 = vrot.lane.b32.xlu1 %v2040_v37, %s1649_s7 }
 0x1c5   : > { %1622 = vrot.lane.b32.xlu0 %v1586_v0, %s1649_s7  ;;  %924 = vrot.lane.b32.xlu1 %v2040_v37, %s1651_s9 }
 0x1c9   : > { %1627 = vrot.lane.b32.xlu0 %v1586_v0, %s1651_s9  ;;  %948 = vrot.lane.b32.xlu1 %v2040_v37, %s1650_s8 }
 0x1cd   : > { %1632 = vrot.lane.b32.xlu0 %v1586_v0, %s1650_s8  ;;  %970 = vrot.lane.b32.xlu1 %v2048_v1, %s1653_s10 }
 0x1d1   : > { %968 = vrot.lane.b32.xlu0 %v2044_v39, %s1653_s10  ;;  %1044 = vperm.xlu1 %1636, %v1041_v62  }
 0x1d5   : > { %972 = vrot.lane.b32.xlu0 %v2040_v37, %s1653_s10 }
 0x1fb   : > { %v2090_v17 = vpop.permute.xlu1 %890  ;;  %v2098_v22 = vpop.permute.xlu0 %914 }
 0x1ff   : > { %v2092_v3 = vpop.permute.xlu1 %938  ;;  %v2100_v23 = vpop.permute.xlu0 %1562 }
 0x200   : > { %v1565_v59 = vunpack.i.h.bf16 %v2100_v23  ;;  %v1564_v18 = vunpack.i.l.bf16 %v2100_v23 }
 0x202   : > { %v852_v2 = vsel %vm322_vm2, %v1564_v18, %v1565_v59 }
 0x203   : > { %v1553_v20 = vpop.permute.xlu1 %1552 }
 0x204   : > { %v1555_v21 = vunpack.i.h.bf16 %v1553_v20  ;;  %v1554_v44 = vunpack.i.l.bf16 %v1553_v20 }
 0x206   : > { %v804_v6 = vsel %vm272_vm0, %v1554_v44, %v1555_v21 }
 0x207   : > { %v1558_v46 = vpop.permute.xlu1 %1557 }
 0x208   : > { %v1560_v47 = vunpack.i.h.bf16 %v1558_v46  ;;  %v1559_v49 = vunpack.i.l.bf16 %v1558_v46 }
 0x20a   : > { %v828_v8 = vsel %vm297_vm1, %v1559_v49, %v1560_v47 }
 0x20b   : > { %v1393_v48 = vpack.c.bf16 %v828_v8, %v804_v6  ;;  %v2102_v50 = vpop.permute.xlu1 %1567 }
 0x20c   : > { %v1570_v57 = vunpack.i.h.bf16 %v2102_v50  ;;  %v1569_v58 = vunpack.i.l.bf16 %v2102_v50  ;;  %v2233_v50 = vld [vmem:[%s2314_s2] sm:$0xff] }
 0x20d   : > { %1394 = vmatprep.subr.bf16.mxu1 %v1393_v48 }
 0x20e   : > { %v876_v11 = vsel %vm347_vm3, %v1569_v58, %v1570_v57 }
 0x20f   : > { %v1397_v36 = vpack.c.bf16 %v876_v11, %v852_v2 }
 0x217   : > { %v2104_v52 = vpop.permute.xlu0 %1572  ;;  %v2106_v56 = vpop.permute.xlu1 %1582 }
 0x218   : > { %v1575_v4 = vunpack.i.h.bf16 %v2104_v52  ;;  %v1574_v5 = vunpack.i.l.bf16 %v2104_v52  ;;  %v1585_v14 = vunpack.i.h.bf16 %v2106_v56  ;;  %v1584_v62 = vunpack.i.l.bf16 %v2106_v56 }
 0x21a   : > { %v905_v30 = vsel %vm378_vm4, %v1574_v5, %v1575_v4  ;;  %v906_v46 = vsel %vm378_vm4, %v2090_v17, %v1574_v5 }
 0x21b   : > { %v2108_v51 = vpop.permute.xlu0 %1577  ;;  %v2110_v54 = vpop.permute.xlu1 %1597  ;;  %v1403_v6 = vpack.c.bf16 %v906_v46, %v2020_v15  ;;  %v954_v15 = vsel %vm428_vm5, %v2092_v3, %v1584_v62 }
 0x21c   : > { %v1600_v60 = vunpack.i.h.bf16 %v2110_v54  ;;  %v1599_v61 = vunpack.i.l.bf16 %v2110_v54  ;;  %v1580_v34 = vunpack.i.h.bf16 %v2108_v51  ;;  %v1579_v25 = vunpack.i.l.bf16 %v2108_v51 }
 0x21e   : > { %v827_v7 = vsel %vm297_vm1, %v1560_v47, %v1600_v60  ;;  %v829_v12 = vsel %vm297_vm1, %v1599_v61, %v1559_v49  ;;  %v1401_v47 = vpack.c.bf16 %v905_v30, %v2022_v43  ;;  %v929_v49 = vsel %vm403_vm6, %v1579_v25, %v1580_v34 }
 0x21f   : > { %v2114_v53 = vpop.permute.xlu0 %1587  ;;  %v2116_v55 = vpop.permute.xlu1 %870  ;;  %v930_v43 = vsel %vm403_vm6, %v2098_v22, %v1579_v25 }
 0x220   : > { %v1589_v41 = vunpack.i.l.bf16 %v2114_v53  ;;  %v877_v42 = vsel %vm347_vm3, %v2116_v55, %v1569_v58  ;;  %v1590_v5 = vunpack.i.h.bf16 %v2114_v53 }
 0x223   : > { %v2122_v10 = vpop.permute.xlu0 %1592  ;;  %v2124_v63 = vpop.permute.xlu1 %1607 }
 0x224   : > { %v1595_v13 = vunpack.i.h.bf16 %v2122_v10  ;;  %v1594_v38 = vunpack.i.l.bf16 %v2122_v10  ;;  %v1609_v40 = vunpack.i.l.bf16 %v2124_v63  ;;  %v1610_v58 = vunpack.i.h.bf16 %v2124_v63 }
 0x226   : > { %v803_v19 = vsel %vm272_vm0, %v1555_v21, %v1595_v13  ;;  %v805_v24 = vsel %vm272_vm0, %v1594_v38, %v1554_v44  ;;  %v802_v32 = vsel %vm272_vm0, %v1595_v13, %v1589_v41  ;;  %v826_v45 = vsel %vm297_vm1, %v1600_v60, %v1609_v40 }
 0x227   : > { %v1395_v35 = vpack.c.bf16 %v829_v12, %v805_v24  ;;  %v1411_v26 = vpack.c.bf16 %v827_v7, %v803_v19  ;;  %v2154_v27 = vpop.permute.xlu0 %1602  ;;  %v2156_v28 = vpop.permute.xlu1 %966  ;;  %v1409_v33 = vpack.c.bf16 %v826_v45, %v802_v32  ;;  %v1407_v13 = vpack.c.bf16 %v954_v15, %v930_v43 }
 0x228   : > { %v1604_v29 = vunpack.i.l.bf16 %v2154_v27  ;;  %v1605_v10 = vunpack.i.h.bf16 %v2154_v27  ;;  %v825_v12 = vsel %vm297_vm1, %v1609_v40, %v1610_v58 }
 0x229   : > { %1396 = vmatpush1.bf16.msra.mxu1 %v1395_v35  ;;  %1410 = vmatprep.subr.bf16.mxu0 %v1409_v33  ;;  %v800_v35 = vsel %vm272_vm0, %v1590_v5, %v1594_v38 }
 0x22a   : > { %v853_v0 = vsel %vm322_vm2, %v1604_v29, %v1564_v18  ;;  %1398 = vmatprep.subr.bf16.mxu1 %v1397_v36  ;;  %1412 = vmatpush1.bf16.msra.mxu0 %v1411_v26  ;;  %v953_v18 = vsel %vm428_vm5, %v1584_v62, %v1585_v14  ;;  %v824_v26 = vsel %vm297_vm1, %v1610_v58, %v1599_v61 }
 0x22b   : > { %v1399_v20 = vpack.c.bf16 %v877_v42, %v853_v0  ;;  %v965_v21 = vpop.permute.xlu0 %964  ;;  %v2176_v44 = vpop.permute.xlu1 %1612  ;;  %v1405_v60 = vpack.c.bf16 %v953_v18, %v929_v49  ;;  %v851_v40 = vsel %vm322_vm2, %v1565_v59, %v1605_v10  ;;  %v1425_v62 = vpack.c.bf16 %v824_v26, %v800_v35 }
 0x22c   : > { %v1614_v2 = vunpack.i.l.bf16 %v2176_v44  ;;  %v1615_v24 = vunpack.i.h.bf16 %v2176_v44  ;;  %v977_v32 = vsel %vm453_vm7, %v965_v21, %v2156_v28 }
 0x22d   : > { %1400 = vmatpush1.bf16.msra.mxu1 %v1399_v20 }
 0x22e   : > { %1402 = vmatprep.subr.bf16.mxu1 %v1401_v47  ;;  %v850_v33 = vsel %vm322_vm2, %v1605_v10, %v1614_v2  ;;  %v848_v0 = vsel %vm322_vm2, %v1615_v24, %v1604_v29 }
 0x22f   : > { %v2187_v8 = vpop.permute.xlu0 %962  ;;  %v869_v48 = vpop.permute.xlu1 %868 }
 0x230   : > { %v872_v61 = vsel %vm347_vm3, %v869_v48, %v2116_v55  ;;  %v978_v25 = vsel %vm453_vm7, %v2187_v8, %v965_v21 }
 0x231   : > { %1404 = vmatpush1.bf16.msra.mxu1 %v1403_v6  ;;  %v1429_v20 = vpack.c.bf16 %v872_v61, %v848_v0 }
 0x232   : > { %1406 = vmatprep.subr.bf16.mxu1 %v1405_v60 }
 0x233   : > { %v1618_v7 = vpop.permute.xlu0 %1617  ;;  %v901_v11 = vpop.permute.xlu1 %900 }
 0x234   : > { %v1620_v63 = vunpack.i.h.bf16 %v1618_v7  ;;  %v1619_v19 = vunpack.i.l.bf16 %v1618_v7  ;;  %v907_v52 = vsel %vm378_vm4, %v901_v11, %v2090_v17 }
 0x235   : > { %1408 = vmatpush1.bf16.msra.mxu1 %v1407_v13 }
 0x236   : > { %v875_v45 = vsel %vm347_vm3, %v1570_v57, %v1619_v19  ;;  %1066 = vmatprep.subr.mxu1 %v977_v32  ;;  %v874_v54 = vsel %vm347_vm3, %v1619_v19, %v1620_v63  ;;  %v801_v57 = vsel %vm272_vm0, %v1589_v41, %v1590_v5  ;;  %v873_v27 = vsel %vm347_vm3, %v1620_v63, %v869_v48 }
 0x237   : > { %v1415_v23 = vpack.c.bf16 %v875_v45, %v851_v40  ;;  %v1623_v38 = vpop.permute.xlu0 %1622  ;;  %v925_v36 = vpop.permute.xlu1 %924  ;;  %v1413_v59 = vpack.c.bf16 %v874_v54, %v850_v33  ;;  %v1427_v42 = vpack.c.bf16 %v825_v12, %v801_v57 }
 0x238   : > { %v1625_v30 = vunpack.i.h.bf16 %v1623_v38  ;;  %v1624_v55 = vunpack.i.l.bf16 %v1623_v38  ;;  %v931_v58 = vsel %vm403_vm6, %v925_v36, %v2098_v22 }
 0x239   : > { %1067 = vmatpush1.msra.mxu1 %v978_v25  ;;  %1414 = vmatprep.subr.bf16.mxu0 %v1413_v59 }
 0x23a   : > { %v904_v53 = vsel %vm378_vm4, %v1575_v4, %v1624_v55  ;;  %1340 = vmatmul.mubr.msk.f32.vlgmr.msra.gmra.mrb[2].mxu1 %vm527_vm8, %v2233_v50  ;;  %1416 = vmatpush1.bf16.msra.mxu0 %v1415_v23  ;;  %v903_v41 = vsel %vm378_vm4, %v1624_v55, %v1625_v30  ;;  %v849_v4 = vsel %vm322_vm2, %v1614_v2, %v1615_v24 }
 0x23b   : > { %v1419_v29 = vpack.c.bf16 %v904_v53, %v2036_v31  ;;  %1426 = vmatprep.subr.bf16.mxu1 %v1425_v62  ;;  %v1628_v21 = vpop.permute.xlu0 %1627  ;;  %v1417_v44 = vpack.c.bf16 %v903_v41, %v2044_v39  ;;  %1256 = vmatprep.mubr.f32.mxu1 %v1652_v9  ;;  %v949_v46 = vpop.permute.xlu1 %948  ;;  %v1431_v47 = vpack.c.bf16 %v873_v27, %v849_v4 }
 0x23c   : > { %1428 = vmatpush1.bf16.msra.mxu1 %v1427_v42  ;;  %v902_v31 = vsel %vm378_vm4, %v1625_v30, %v901_v11  ;;  %v1630_v49 = vunpack.i.h.bf16 %v1628_v21  ;;  %v1629_v6 = vunpack.i.l.bf16 %v1628_v21  ;;  %v1433_v9 = vpack.c.bf16 %v907_v52, %v2040_v37 }
 0x23d   : > { %1430 = vmatprep.subr.bf16.mxu1 %v1429_v20  ;;  %1418 = vmatprep.subr.bf16.mxu0 %v1417_v44  ;;  %v955_v17 = vsel %vm428_vm5, %v949_v46, %v2092_v3  ;;  %v1435_v43 = vpack.c.bf16 %v902_v31, %v2048_v1 }
 0x23e   : > { %1420 = vmatpush1.bf16.msra.mxu0 %v1419_v29  ;;  %v928_v37 = vsel %vm403_vm6, %v1580_v34, %v1629_v6  ;;  %v927_v60 = vsel %vm403_vm6, %v1629_v6, %v1630_v49  ;;  %v1437_v15 = vpack.c.bf16 %v955_v17, %v931_v58  ;;  %v926_v56 = vsel %vm403_vm6, %v1630_v49, %v925_v36 }
 0x23f   : > { %v1633_v39 = vpop.permute.xlu0 %1632  ;;  %v971_v34 = vpop.permute.xlu1 %970 }
 0x240   : > { %v1635_v48 = vunpack.i.h.bf16 %v1633_v39  ;;  %v1634_v18 = vunpack.i.l.bf16 %v1633_v39  ;;  %1432 = vmatpush1.bf16.msra.mxu1 %v1431_v47 }
 0x241   : > { %1434 = vmatprep.subr.bf16.mxu1 %v1433_v9 }
 0x242   : > { %v952_v3 = vsel %vm428_vm5, %v1585_v14, %v1634_v18  ;;  %v951_v1 = vsel %vm428_vm5, %v1634_v18, %v1635_v48  ;;  %v950_v22 = vsel %vm428_vm5, %v1635_v48, %v949_v46 }
 0x243   : > { %v1423_v10 = vpack.c.bf16 %v952_v3, %v928_v37  ;;  %v969_v51 = vpop.permute.xlu0 %968  ;;  %v1421_v2 = vpack.c.bf16 %v951_v1, %v927_v60  ;;  %v1439_v14 = vpack.c.bf16 %v950_v22, %v926_v56 }
 0x244   : > { %1436 = vmatpush1.bf16.msra.mxu1 %v1435_v43  ;;  %v975_v13 = vsel %vm453_vm7, %v969_v51, %v971_v34  ;;  %v976_v11 = vsel %vm453_vm7, %v2156_v28, %v969_v51 }
 0x245   : > { %1438 = vmatprep.subr.bf16.mxu1 %v1437_v15  ;;  %1422 = vmatprep.subr.bf16.mxu0 %v1421_v2 }
 0x246   : > { %1424 = vmatpush1.bf16.msra.mxu0 %v1423_v10 }
 0x247   : > { %v973_v5 = vpop.permute.xlu0 %972  ;;  %1137 = vmatprep.subr.mxu0 %v975_v13 }
 0x248   : > { %1440 = vmatpush1.bf16.msra.mxu1 %v1439_v14  ;;  %v979_v7 = vsel %vm453_vm7, %v973_v5, %v2187_v8  ;;  %v974_v12 = vsel %vm453_vm7, %v971_v34, %v973_v5 }
 0x249   : > { %1208 = vmatprep.subr.mxu1 %v979_v7 }
 0x24a   : > { %1138 = vmatpush1.msra.mxu0 %v976_v11 }
 0x24b   : > { %1341 = vmatmul.mubr.msk.f32.vlgmr.msra.gmra.mrb[4].mxu0 %vm527_vm8, %v2233_v50 }
 0x24c   : > { %1209 = vmatpush1.msra.mxu1 %v974_v12 }
 0x24d   : > { %1342 = vmatmul.mubr.msk.f32.vlgmr.msra.gmra.mrb[4].mxu1 %vm527_vm8, %v2233_v50 }
 0x250   : > { %v1045_v63 = vpop.permute.xlu1 %1044 }
 0x30d   : > { %v1116_v19 = vpop.f32.mrb[2].mxu1 }
 0x30e   : > { %v1117_v24 = vadd.f32 %v1116_v19, %v1045_v63  ;;  %v1118_v8 = vpop.f32.mrb[3].mxu1 }
 0x30f   : > { %v1119_v28 = vadd.f32 %v1118_v8, %v1045_v63 }
 0x310   : > { %v1263_v32 = vmax.f32 %v1117_v24, 0.0 }
 0x311   : > { %v1264_v16 = vmax.f32 %v1119_v28, 0.0 }
 0x312   : > { %1269 = vst [vmem:[%s251_s26] sm:$0xff] %v1263_v32 }
 0x313   : > { %1270 = vst [vmem:[%s251_s26 + $0x8] sm:$0xff] %v1264_v16 }
 0x31e   : > { %v1187_v35 = vpop.f32.mrb[4].mxu0 }
 0x31f   : > { %v1188_v26 = vadd.f32 %v1187_v35, %v1045_v63  ;;  %v1189_v40 = vpop.f32.mrb[5].mxu0 }
 0x320   : > { %v1190_v45 = vadd.f32 %v1189_v40, %v1045_v63  ;;  %v1258_v33 = vpop.f32.mrb[4].mxu1 }
 0x321   : > { %v1265_v54 = vmax.f32 %v1188_v26, 0.0  ;;  %v1259_v61 = vadd.f32 %v1258_v33, %v1045_v63  ;;  %v1260_v23 = vpop.f32.mrb[5].mxu1 }
 0x322   : > { %v1266_v38 = vmax.f32 %v1190_v45, 0.0  ;;  %v1261_v36 = vadd.f32 %v1260_v23, %v1045_v63 }
 0x323   : > { %1271 = vst [vmem:[%s251_s26 + $0x10] sm:$0xff] %v1265_v54  ;;  %v1267_v59 = vmax.f32 %v1259_v61, 0.0 }
 0x324   : > { %1272 = vst [vmem:[%s251_s26 + $0x18] sm:$0xff] %v1266_v38  ;;  %v1268_v50 = vmax.f32 %v1261_v36, 0.0 }
 0x325   : > { %1273 = vst [vmem:[%s251_s26 + $0x20] sm:$0xff] %v1267_v59 }
 0x326   : > { %1274 = vst [vmem:[%s251_s26 + $0x28] sm:$0xff] %v1268_v50 }
 0x327 PF: > { %s16_s21 = sadd.s32 1, %s1643_s21  }
 0x328   : > { %p13_p4 = scmp.ge.s32.totalorder %s16_s21, 4  }
 0x32a   :  { %15 = sbr.rel (!%p13_p4) target bundleno = 1 (0x1), region = 74 }

</bundles_post_ra>
